<compile_context>
chip_gen: v7x
topology: tpu7x:2x2x1
jax: 0.10.0
libtpu: 0.0.40
codegen_flags: <defaults>
</compile_context>

<pallas_src>
from functools import partial

import jax
import jax.numpy as jnp
from jax.experimental import pallas as pl
from jax.experimental.pallas import tpu as pltpu

EPS = 1e-5

# ---------------------------------------------------------------------------
# pltpu.roll convention self-check
# ---------------------------------------------------------------------------
_ROLL_IS_NUMPY = None


def _roll_uses_numpy_convention():
    """One-vreg probe pinning down pltpu.roll's rotation direction so the conv
    taps cannot be silently mirrored (numpy convention: out[i] = in[i - shift])."""
    global _ROLL_IS_NUMPY
    if _ROLL_IS_NUMPY is None:
        def probe(x_ref, o_ref):
            o_ref[...] = pltpu.roll(x_ref[...], 1, axis=1)

        x = jnp.broadcast_to(jnp.arange(128, dtype=jnp.float32), (8, 128))
        vmem = pl.BlockSpec(memory_space=pltpu.MemorySpace.VMEM)
        out = pl.pallas_call(
            probe,
            out_shape=jax.ShapeDtypeStruct((8, 128), jnp.float32),
            in_specs=[vmem],
            out_specs=vmem,
        )(x)
        _ROLL_IS_NUMPY = bool(out[0, 0] == 127.0)
    return _ROLL_IS_NUMPY


# ---------------------------------------------------------------------------
# Fused ResLayer kernel
# ---------------------------------------------------------------------------
def _make_res_layer_kernel(N, C, H, W, roll_is_numpy):
    HW = H * W
    R = N * HW                       # flattened pixel axis -> 128-lane axis
    CP = ((C + 7) // 8) * 8          # 8-aligned per-tap sublane slot width
    f32 = jnp.float32
    TAPS = tuple((di, dj) for di in (-1, 0, 1) for dj in (-1, 0, 1))

    def shift_amount(off):
        # We need shifted[p] == x[p + off]; under the numpy convention
        # (out[i] = in[i - s]) that is s = -off, otherwise s = +off.
        s = -off if roll_is_numpy else off
        return s % R

    def kernel(x_ref, w_ref, bn_ref, o_ref, scr_ref):
        # Zero the im2col scratch ONCE: rows [t*CP+C, (t+1)*CP) of every slot
        # must be 0 (uninitialized VMEM could hold NaN; 0 * NaN = NaN even
        # though the matching weight columns are zero-padded).
        scr_ref[...] = jnp.zeros_like(scr_ref)

        # ---- relayout (N*C, HW) -> channel-major, lane-dense (C, N*HW) ----
        parts = [x_ref[pl.ds(n * C, C), :].astype(f32) for n in range(N)]
        x = parts[0] if N == 1 else jnp.concatenate(parts, axis=1)   # [C, R]

        # ---- per-tap source-validity masks: computed once, reused twice ----
        lane = jax.lax.broadcasted_iota(jnp.int32, (C, R), 1)
        w_idx = lane % W
        h_idx = (lane // W) % H
        tap_mask = []
        for di, dj in TAPS:
            conds = []
            if di == -1:
                conds.append(h_idx >= 1)
            if di == 1:
                conds.append(h_idx <= H - 2)
            if dj == -1:
                conds.append(w_idx >= 1)
            if dj == 1:
                conds.append(w_idx <= W - 2)
            m = None
            for c in conds:
                m = c if m is None else (m & c)
            tap_mask.append(m)                       # None for the center tap

        def conv3x3(inp, w_mat):
            """3x3 same-padding conv as ONE matmul: build the im2col RHS in
            the scratch (tap t -> sublane slot [t*CP, t*CP + C), taps made by
            pltpu.roll on the XLU + boundary masks), then a single
            [C, 9*CP] @ [9*CP, R] on the MXU, accumulated in f32."""
            for t, (di, dj) in enumerate(TAPS):
                off = di * W + dj
                shifted = inp if off == 0 else pltpu.roll(
                    inp, shift_amount(off), axis=1)
                if tap_mask[t] is not None:
                    shifted = jnp.where(tap_mask[t], shifted, 0.0)
                scr_ref[pl.ds(t * CP, C), :] = shifted
            return jnp.dot(w_mat, scr_ref[...], preferred_element_type=f32)

        def batchnorm(z, g, beta):
            # Training-mode BN: biased per-channel batch stats, two-pass f32.
            inv_r = 1.0 / R
            mean = jnp.sum(z, axis=1, keepdims=True) * inv_r          # [C, 1]
            centered = z - mean
            var = jnp.sum(centered * centered, axis=1, keepdims=True) * inv_r
            return centered * (jax.lax.rsqrt(var + EPS) * g) + beta

        bn = bn_ref[...].astype(f32)            # [C, 4] = g1 | beta1 | g2 | beta2
        g1, beta1 = bn[:, 0:1], bn[:, 1:2]
        g2, beta2 = bn[:, 2:3], bn[:, 3:4]
        w1 = w_ref[0].astype(f32)               # [C, 9*CP]
        w2 = w_ref[1].astype(f32)

        h1 = jnp.maximum(batchnorm(conv3x3(x, w1), g1, beta1), 0.0)
        y = jnp.maximum(batchnorm(conv3x3(h1, w2), g2, beta2) + x, 0.0)

        # ---- relayout back (C, N*HW) -> (N*C, HW); stores are 256-lane wide ----
        for n in range(N):
            o_ref[pl.ds(n * C, C), :] = \
                y[:, n * HW:(n + 1) * HW].astype(o_ref.dtype)

    return kernel


@partial(jax.jit, static_argnames=("roll_is_numpy",))
def _res_layer_forward(x_nchw, w_all, bn_packed, roll_is_numpy):
    N, C, H, W = x_nchw.shape
    HW = H * W
    CP = ((C + 7) // 8) * 8

    x_flat = x_nchw.reshape(N * C, HW)        # pure reshape (bitcast), no HBM copy

    vmem = pl.BlockSpec(memory_space=pltpu.MemorySpace.VMEM)
    out_flat = pl.pallas_call(
        _make_res_layer_kernel(N, C, H, W, roll_is_numpy),
        out_shape=jax.ShapeDtypeStruct((N * C, HW), x_nchw.dtype),
        in_specs=[vmem, vmem, vmem],          # x, stacked weights, packed BN
        out_specs=vmem,
        scratch_shapes=[pltpu.VMEM((9 * CP, N * HW), jnp.float32)],  # im2col RHS
    )(x_flat, w_all, bn_packed)

    return out_flat.reshape(N, C, H, W)       # pure reshape (bitcast), no HBM copy


def res_layer_forward(x_nchw, w_all, bn_packed):
    """ResLayer.forward: ReLU( BN2(Conv2( ReLU(BN1(Conv1(x))) )) + x ), NCHW in/out."""
    return _res_layer_forward(x_nchw, w_all, bn_packed,
                              roll_is_numpy=_roll_uses_numpy_convention())


# ---------------------------------------------------------------------------
# Params, packing & pure-JAX reference
# ---------------------------------------------------------------------------
def init_params(key, C):
    """Deterministic init matching the module's shapes.
    Conv2d(C, C, 3): weight [Cout, Cin, 3, 3] -> stored here as [3, 3, Cin, Cout];
    BatchNorm2d(C): gamma=1, beta=0 (PyTorch default affine init)."""
    k1, k2, k3, k4 = jax.random.split(key, 4)
    fan_in = C * 3 * 3
    lim = (1.0 / fan_in) ** 0.5
    w1 = jax.random.uniform(k1, (3, 3, C, C), jnp.float32, -lim, lim)
    b1 = jax.random.uniform(k2, (C,), jnp.float32, -lim, lim)
    w2 = jax.random.uniform(k3, (3, 3, C, C), jnp.float32, -lim, lim)
    b2 = jax.random.uniform(k4, (C,), jnp.float32, -lim, lim)
    ones = jnp.ones((C,), jnp.float32)
    zeros = jnp.zeros((C,), jnp.float32)
    return {"w1": w1, "b1": b1, "g1": ones, "beta1": zeros,
            "w2": w2, "b2": b2, "g2": ones, "beta2": zeros}


def pack_params(p):
    """Pack params once into the kernel layout (do this at model-build time so
    per-call overhead is just 3 input DMAs).

    Returns:
      w_all:     [2, C, 9*CP]  im2col weights, ci zero-padded to 8-wide slots
      bn_packed: [C, 4]        columns = g1 | beta1 | g2 | beta2
    NOTE: conv biases p["b1"]/p["b2"] are intentionally NOT packed -- they
    cancel exactly inside training-mode BatchNorm."""
    C = p["g1"].shape[0]
    CP = ((C + 7) // 8) * 8

    def im2col_weights(w):
        w_t = jnp.transpose(w, (0, 1, 3, 2)).reshape(9, C, C)     # [tap, co, ci]
        w_t = jnp.pad(w_t, ((0, 0), (0, 0), (0, CP - C)))         # pad ci -> CP
        return jnp.transpose(w_t, (1, 0, 2)).reshape(C, 9 * CP)   # [co, tap*CP+ci]

    w_all = jnp.stack([im2col_weights(p["w1"]), im2col_weights(p["w2"])], axis=0)
    bn_packed = jnp.stack([p["g1"], p["beta1"], p["g2"], p["beta2"]], axis=1)
    return w_all.astype(jnp.float32), bn_packed.astype(jnp.float32)


def ref_forward(x_nchw, p):
    """Pure-JAX reference (with conv bias, two-pass BN stats) for correctness."""
    x = jnp.transpose(x_nchw, (0, 2, 3, 1))

    def conv_bn(xi, w, b, g, beta):
        N, H, W, C = xi.shape
        xp = jnp.pad(xi, ((0, 0), (1, 1), (1, 1), (0, 0)))
        acc = jnp.zeros((N, H, W, C), jnp.float32)
        for ki in range(3):
            for kj in range(3):
                acc = acc + jnp.einsum(
                    "nhwc,cd->nhwd", xp[:, ki:ki + H, kj:kj + W, :], w[ki, kj],
                    preferred_element_type=jnp.float32)
        acc = acc + b
        mean = jnp.mean(acc, axis=(0, 1, 2), keepdims=True)
        var = jnp.mean((acc - mean) ** 2, axis=(0, 1, 2), keepdims=True)
        return (acc - mean) * jax.lax.rsqrt(var + EPS) * g + beta

    h = jnp.maximum(conv_bn(x, p["w1"], p["b1"], p["g1"], p["beta1"]), 0.0)
    y = jnp.maximum(conv_bn(h, p["w2"], p["b2"], p["g2"], p["beta2"]) + x, 0.0)
    return jnp.transpose(y, (0, 3, 1, 2))


if __name__ == "__main__":
    key = jax.random.PRNGKey(0)
    kx, kp = jax.random.split(key)

    N, C, H, W = 2, 4, 16, 16                  # NCHW input (PyTorch layout)
    x = jax.random.normal(kx, (N, C, H, W), jnp.float32)
    params = init_params(kp, C)
    w_all, bn_packed = pack_params(params)     # packed once, reused every call

    out = jax.block_until_ready(res_layer_forward(x, w_all, bn_packed))
    ref = jax.block_until_ready(ref_forward(x, params))

    assert out.shape == (N, C, H, W)
    assert jnp.allclose(out, ref, atol=2e-2, rtol=2e-2)

    print("KERNEL_OK")
</pallas_src>

<mosaic_0001>
module attributes {stable_mosaic.version = 11 : i64} {
  func.func @probe(%arg0: memref<8x128xf32, #tpu.memory_space<vmem>>, %arg1: memref<8x128xf32, #tpu.memory_space<vmem>>) attributes {dimension_semantics = [], scalar_prefetch = 0 : i64, scratch_operands = 0 : i64, tpu.core_type = #tpu.core_type<tc>} {
    %c0 = arith.constant 0 : index
    %c0_0 = arith.constant 0 : index
    %0 = vector.load %arg0[%c0, %c0_0] : memref<8x128xf32, #tpu.memory_space<vmem>>, vector<8x128xf32>
    %c1_i32 = arith.constant 1 : i32
    %1 = tpu.dynamic_rotate %0 by %c1_i32 dim 1 : vector<8x128xf32>, i32 -> vector<8x128xf32>
    %c0_1 = arith.constant 0 : index
    %c0_2 = arith.constant 0 : index
    %2 = vector.load %arg1[%c0_1, %c0_2] : memref<8x128xf32, #tpu.memory_space<vmem>>, vector<8x128xf32>
    tpu.vector_store %arg1[%c0_1, %c0_2], %1 {strides = array<i32>} : memref<8x128xf32, #tpu.memory_space<vmem>>, vector<8x128xf32>,
    return
  }
}

</mosaic_0001>

<bundles_post_ra>
// kernel: tpu_custom_call.1
= control target key start
LH: loop header
LB: loop body
LE: loop exit
PB: predicated region body
PF: predicated region fallthrough
CT: control target
= control target key end

     0   :  { %6 = vsyncpa [#allocation3], 0  ;;  %s128_s0 = inlined_call_operand.hbm [shape: f32[8,128], index: 0, kind: input, shape index: {}]   ;;  %s129_s1 = inlined_call_operand.hbm [shape: f32[8,128], index: 1, kind: output, shape index: {}]  }
   0x1   :  { %7 = vsyncpa [#allocation4], 0  ;;  %s91_s6 = smov [#allocation2]   ;;  %s43_s10 = scalar_lea.hbm %s128_s0, 128 }
   0x2   :  { %s14_s7 = sshll.u32 %s91_s6, 4  ;;  %p44_p0 = scmp.ne.s32.totalorder %s128_s0, %s43_s10  ;;  %s15_s7 = int_to_ptr.vmem [resolvable:$true] %s14_s7 }
   0x3   :  { %p47_p1 = scmp.lt.u32.totalorder %s43_s10, %s128_s0 }
   0x5   :  { %p49_p2 = pnand %p47_p1, %p44_p0 }
   0x7   :  { %52 = shalt.err (!%p49_p2)
}
   0x8   :  { %s53_s15 = scalar_lea.vmem %s15_s7, 128  ;;  %p58_p4 = scmp.lt.s32.totalorder %s15_s7, %s15_s7 }
   0x9   :  { %p54_p3 = scmp.ne.s32.totalorder %s15_s7, %s53_s15  ;;  %p59_p5 = scmp.lt.s32.totalorder %s53_s15, %s53_s15 }
   0xb   :  { %p60_p6 = por %p59_p5, %p58_p4 }
   0xd   :  { %p61_p7 = pnand %p60_p6, %p54_p3 }
   0xf   :  { %64 = shalt.err (!%p61_p7)
}
  0x10   :  { %17 = dma.hbm_to_vmem [thread:$0]  %s128_s0, 128, %s15_s7, [#allocation3]  }
  0x11   :  { %87 = dma.done.wait [#allocation3], 128  }
  0x12   :  { %88 = vsyncadd [#allocation3], 4294967168  ;;  %v21_v0 = vld [vmem:[#allocation2] sm:$0xff]  ;;  %s92_s18 = smov 1   ;;  %s93_s19 = smov [#allocation5]  }
  0x13   :  { %22 = vrot.lane.b32.xlu0 %v21_v0, %s92_s18  ;;  %s31_s20 = sshll.u32 %s93_s19, 4  ;;  %s32_s20 = int_to_ptr.vmem [resolvable:$true] %s31_s20 }
  0x14   :  { %s65_s21 = scalar_lea.vmem %s32_s20, 128  ;;  %p70_p9 = scmp.lt.s32.totalorder %s32_s20, %s32_s20 }
  0x15   :  { %p66_p8 = scmp.ne.s32.totalorder %s32_s20, %s65_s21  ;;  %p71_p10 = scmp.lt.s32.totalorder %s65_s21, %s65_s21 }
  0x17   :  { %p72_p11 = por %p71_p10, %p70_p9 }
  0x19   :  { %p73_p12 = pnand %p72_p11, %p66_p8 }
  0x85   :  { %v23_v1 = vpop.permute.xlu0 %22 }
  0x86   :  { %24 = vst [vmem:[#allocation5] sm:$0xff] %v23_v1 }
  0x87   :  { %76 = shalt.err (!%p73_p12)
}
  0x88   :  { %s77_s0 = scalar_lea.hbm %s129_s1, 128 }
  0x89   :  { %p78_p13 = scmp.ne.s32.totalorder %s129_s1, %s77_s0  ;;  %p81_p0 = scmp.lt.u32.totalorder %s77_s0, %s129_s1 }
  0x8b   :  { %p83_p1 = pnand %p81_p0, %p78_p13 }
  0x8d   :  { %86 = shalt.err (!%p83_p1)
}
  0x8e   :  { %34 = dma.vmem_to_hbm [thread:$0]  %s32_s20, 128, %s129_s1, [#allocation4]  }
  0x8f   :  { %89 = dma.done.wait [#allocation4], 128  }
  0x90   :  { %90 = vsyncadd [#allocation4], 4294967168 }
  0x91   :  { %38 = vsyncpa [#allocation3], 1 }
  0x92   :  { %39 = vsyncpa [#allocation4], 1 }

</bundles_post_ra>
